<compile_context>
chip_gen: v7x
topology: tpu7x:2x2x1
jax: 0.10.0
libtpu: 0.0.40
codegen_flags: <defaults>
</compile_context>

<pallas_src>
import functools
import math

import jax
import jax.numpy as jnp
from jax import lax
from jax.experimental import pallas as pl
from jax.experimental.pallas import tpu as pltpu


# ---------------------------------------------------------------------------
# Small helpers
# ---------------------------------------------------------------------------
def _largest_divisor_leq(n, cap):
    cap = min(cap, n)
    for d in range(cap, 0, -1):
        if n % d == 0:
            return d
    return 1


def avg_pool2(x):
    """nn.AvgPool2d(kernel_size=2, stride=2) on NHWC (floors odd dims)."""
    N, H, W, C = x.shape
    Hc, Wc = (H // 2) * 2, (W // 2) * 2
    x = x[:, :Hc, :Wc, :]
    return x.reshape(N, Hc // 2, 2, Wc // 2, 2, C).mean(axis=(2, 4))


def interp_nearest(x, size):
    """F.interpolate(mode='nearest') to (Ho, Wo) on NHWC."""
    N, H, W, C = x.shape
    Ho, Wo = size
    if (H, W) == (Ho, Wo):
        return x
    if Ho % H == 0 and Wo % W == 0:                      # exact upsample: repeat
        return jnp.repeat(jnp.repeat(x, Ho // H, axis=1), Wo // W, axis=2)
    ih = (jnp.arange(Ho) * H) // Ho
    iw = (jnp.arange(Wo) * W) // Wo
    return x[:, ih][:, :, iw]


# ---------------------------------------------------------------------------
# Pallas conv kernel: stride-1 conv, im2col -> single MXU matmul, fused
# bias add and fused residual ("branch") add in the epilogue.
# ---------------------------------------------------------------------------
def _conv_kernel(*refs, KH, KW, has_bias, has_residual):
    """One (batch, H-tile) grid step.

    x_ref: (1, Hp, Wp, Cin)      padded input, resident across the H-tile axis
    w_ref: (KH*KW*Cin, Cout)     flattened weights, resident across the grid
    b_ref: (1, Cout)             optional bias
    r_ref: (1, TH, Wo, Cout)     optional residual (fused branch add)
    o_ref: (1, TH, Wo, Cout)
    """
    it = iter(refs)
    x_ref = next(it)
    w_ref = next(it)
    b_ref = next(it) if has_bias else None
    r_ref = next(it) if has_residual else None
    o_ref = next(it)

    _, TH, Wo, Cout = o_ref.shape
    K = w_ref.shape[0]
    h = pl.program_id(1)
    row0 = h * TH
    # Rows [row0, row0 + TH + KH - 1) of the resident padded image feed this tile.
    xs = x_ref[0, pl.ds(row0, TH + KH - 1), :, :]            # (TH+KH-1, Wp, Cin)

    # In-kernel im2col: one (TH*Wo, KH*KW*Cin) x (KH*KW*Cin, Cout) matmul instead of
    # KH*KW tiny K=Cin matmuls.  For realistic channel counts (Cin multiple of 128)
    # the concat pieces are lane-aligned and the matmul is MXU-shaped.
    taps = [xs[kh:kh + TH, kw:kw + Wo, :]
            for kh in range(KH) for kw in range(KW)]
    patch = taps[0] if len(taps) == 1 else jnp.concatenate(taps, axis=-1)
    acc = jnp.dot(patch.reshape(TH * Wo, K), w_ref[...],
                  preferred_element_type=jnp.float32)         # (TH*Wo, Cout)
    acc = acc.reshape(TH, Wo, Cout)
    if has_bias:
        acc = acc + b_ref[...].astype(jnp.float32)            # (1, Cout) broadcasts
    if has_residual:
        acc = acc + r_ref[0].astype(jnp.float32)              # fused branch add
    o_ref[0] = acc.astype(o_ref.dtype)


def conv2d_nhwc(x, w, padding, bias=None, residual=None,
                block_h_target=8, compute_dtype=None):
    """Stride-1 2-D convolution (NHWC, weights HWIO) with fused bias / residual add.

    `compute_dtype=jnp.bfloat16` casts activations+weights at the call boundary
    (f32 accumulation is kept inside the kernel) -- recommended on v6e/v7x.
    """
    N, H, W, Cin = x.shape
    KH, KW, Cin_w, Cout = w.shape
    assert Cin_w == Cin
    out_dtype = x.dtype

    x_pad = jnp.pad(x, ((0, 0), (padding, padding), (padding, padding), (0, 0)))
    Hp, Wp = H + 2 * padding, W + 2 * padding
    Ho, Wo = Hp - KH + 1, Wp - KW + 1
    assert Ho > 0 and Wo > 0, "kernel larger than padded input"

    # Output rows per grid step; keeps the accumulator / output tile small and
    # gives the pipeline more than `batch` steps to hide DMA behind compute.
    TH = _largest_divisor_leq(Ho, block_h_target)
    num_h = Ho // TH

    w2 = w.reshape(KH * KW * Cin, Cout)
    if compute_dtype is not None:
        x_pad = x_pad.astype(compute_dtype)
        w2 = w2.astype(compute_dtype)

    in_specs = [
        # Full padded image per batch element; block index ignores `h`, so the
        # block is held resident (not re-fetched) across the H-tile axis.
        pl.BlockSpec((1, Hp, Wp, Cin), lambda n, h: (n, 0, 0, 0)),
        # Flattened weights, constant block index -> resident across the grid.
        pl.BlockSpec((KH * KW * Cin, Cout), lambda n, h: (0, 0)),
    ]
    args = [x_pad, w2]

    has_bias = bias is not None
    has_residual = residual is not None
    if has_bias:
        in_specs.append(pl.BlockSpec((1, Cout), lambda n, h: (0, 0)))
        args.append(jnp.asarray(bias, jnp.float32).reshape(1, Cout))
    if has_residual:
        assert residual.shape == (N, Ho, Wo, Cout), (residual.shape, (N, Ho, Wo, Cout))
        in_specs.append(pl.BlockSpec((1, TH, Wo, Cout), lambda n, h: (n, h, 0, 0)))
        args.append(residual)

    kernel = functools.partial(_conv_kernel, KH=KH, KW=KW,
                               has_bias=has_bias, has_residual=has_residual)
    return pl.pallas_call(
        kernel,
        out_shape=jax.ShapeDtypeStruct((N, Ho, Wo, Cout), out_dtype),
        grid=(N, num_h),
        in_specs=in_specs,
        out_specs=pl.BlockSpec((1, TH, Wo, Cout), lambda n, h: (n, h, 0, 0)),
        compiler_params=pltpu.CompilerParams(
            # Both axes independent -> shardable across 2 TensorCores on v7x.
            dimension_semantics=("parallel", "parallel"),
            # Explicit cap with headroom for v7x's 64 MiB physical VMEM.
            vmem_limit_bytes=48 * 1024 * 1024,
        ),
    )(*args)


# ---------------------------------------------------------------------------
# Tiled elementwise add (fallback only -- the common-path branch adds are fused
# into the conv epilogue via `residual=`).
# ---------------------------------------------------------------------------
def _add_kernel(a_ref, b_ref, o_ref):
    o_ref[...] = a_ref[...] + b_ref[...]


def pallas_add(a, b):
    assert a.shape == b.shape
    N = a.shape[0]
    blk = (1,) + a.shape[1:]
    ndim = a.ndim
    idx = lambda n: (n,) + (0,) * (ndim - 1)
    return pl.pallas_call(
        _add_kernel,
        out_shape=jax.ShapeDtypeStruct(a.shape, a.dtype),
        grid=(N,),
        in_specs=[pl.BlockSpec(blk, idx), pl.BlockSpec(blk, idx)],
        out_specs=pl.BlockSpec(blk, idx),
        compiler_params=pltpu.CompilerParams(dimension_semantics=("parallel",)),
    )(a, b)


# ---------------------------------------------------------------------------
# OctConv2d module (mirrors the PyTorch forward semantics exactly)
# ---------------------------------------------------------------------------
class OctConv2dPallas:
    def __init__(self, in_channels, out_channels, kernel_size, stride=1,
                 padding=0, alpha=0.5, bias=False, dilation=1, groups=1,
                 key=None, compute_dtype=None):
        assert stride in (1, 2), "Only strides of 1 and 2 are supported"
        # TODO(synk): dilation > 1 and groups > 1 not implemented in the kernel.
        assert dilation == 1 and groups == 1
        if isinstance(alpha, tuple):
            assert len(alpha) == 2
            self.alpha_in, self.alpha_out = alpha
        else:
            self.alpha_in = self.alpha_out = alpha
        in_ch_hf = int((1 - self.alpha_in) * in_channels)
        self.in_channels = {'high': in_ch_hf, 'low': in_channels - in_ch_hf}
        out_ch_hf = int((1 - self.alpha_out) * out_channels)
        self.out_channels = {'high': out_ch_hf, 'low': out_channels - out_ch_hf}
        self.kernel_size = kernel_size
        self.stride = stride
        self.padding = padding
        self.use_bias = bias
        self.compute_dtype = compute_dtype

        if key is None:
            key = jax.random.PRNGKey(0)
        keys = iter(jax.random.split(key, 8))

        def make_conv(cin, cout, enabled):
            if not enabled:
                return None, None
            k = kernel_size
            bound = 1.0 / math.sqrt(max(cin, 1) * k * k)   # PyTorch Conv2d default
            w = jax.random.uniform(next(keys), (k, k, cin, cout),
                                   jnp.float32, -bound, bound)
            b = (jax.random.uniform(next(keys), (cout,), jnp.float32,
                                    -bound, bound) if bias else None)
            return w, b

        self.w_h2h, self.b_h2h = make_conv(
            self.in_channels['high'], self.out_channels['high'],
            not (self.alpha_in == 1 or self.alpha_out == 1))
        self.w_h2l, self.b_h2l = make_conv(
            self.in_channels['high'], self.out_channels['low'],
            not (self.alpha_in == 1 or self.alpha_out == 0))
        self.w_l2h, self.b_l2h = make_conv(
            self.in_channels['low'], self.out_channels['high'],
            not (self.alpha_in == 0 or self.alpha_out == 1))
        self.w_l2l, self.b_l2l = make_conv(
            self.in_channels['low'], self.out_channels['low'],
            not (self.alpha_in == 0 or self.alpha_out == 0))

    def _check_inputs(self, x_h, x_l):
        if x_h is not None:
            assert x_h.ndim == 4
        if x_l is not None:
            assert x_l.ndim == 4
        if self.in_channels['high'] > 0:
            assert x_h.shape[1] == self.in_channels['high']
        if self.in_channels['low'] > 0:
            assert x_l.shape[1] == self.in_channels['low']

    def __call__(self, x):
        x_h, x_l = x if isinstance(x, tuple) else (x, None)
        self._check_inputs(x_h, x_l)                    # NCHW checks, like PyTorch

        to_nhwc = lambda t: None if t is None else jnp.transpose(t, (0, 2, 3, 1))
        to_nchw = lambda t: None if t is None else jnp.transpose(t, (0, 3, 1, 2))
        x_h, x_l = to_nhwc(x_h), to_nhwc(x_l)

        ch_h, ch_l = self.out_channels['high'], self.out_channels['low']
        p, k, s = self.padding, self.kernel_size, self.stride
        cd = self.compute_dtype
        conv_out = lambda t: (t.shape[1] + 2 * p - k + 1, t.shape[2] + 2 * p - k + 1)

        x_h2h = x_h2l = x_l2l = x_l2h = None

        # ---- low-frequency input branch (runs first so its outputs can be fused
        #      into the high-frequency branch epilogues as residual adds) ----
        if x_l is not None:
            if s == 1 and ch_h > 0 and ch_l > 0:
                # conv_l2h and conv_l2l consume the same input -> one fused conv
                # with the weights concatenated along Cout.
                w_cat = jnp.concatenate([self.w_l2h, self.w_l2l], axis=-1)
                b_cat = (jnp.concatenate([self.b_l2h, self.b_l2l])
                         if self.use_bias else None)
                y = conv2d_nhwc(x_l, w_cat, p, bias=b_cat, compute_dtype=cd)
                x_l2h, x_l2l = y[..., :ch_h], y[..., ch_h:]
            else:
                if ch_l > 0:
                    x_l2l_in = avg_pool2(x_l) if s == 2 else x_l
                    x_l2l = conv2d_nhwc(x_l2l_in, self.w_l2l, p, bias=self.b_l2l,
                                        compute_dtype=cd)
                if ch_h > 0:
                    x_l2h = conv2d_nhwc(x_l, self.w_l2h, p, bias=self.b_l2h,
                                        compute_dtype=cd)
            if ch_h > 0 and s == 1:
                # Same target as the reference: x_h2h's spatial size (known
                # analytically -- the h2h conv runs later) or 2x the low res.
                if x_h is not None:
                    target = conv_out(x_h)
                else:
                    target = (2 * x_l.shape[1], 2 * x_l.shape[2])
                x_l2h = interp_nearest(x_l2h, target)

        # ---- high-frequency input branch (with fused residual adds) ----
        if x_h is not None:
            if ch_h > 0 and s == 2:
                x_h = avg_pool2(x_h)
            if ch_h > 0:
                res = None
                if x_l2h is not None:
                    if x_l2h.shape[1:3] != conv_out(x_h):
                        x_l2h = interp_nearest(x_l2h, conv_out(x_h))
                    res = x_l2h
                    x_l2h = None                      # consumed by fused epilogue
                x_h2h = conv2d_nhwc(x_h, self.w_h2h, p, bias=self.b_h2h,
                                    residual=res, compute_dtype=cd)
            if ch_l > 0:
                # NOTE: matches the reference exactly, including the corner case
                # stride==2 & ch_h==0 where x_h is NOT pre-pooled before this pool.
                x_h2l_in = avg_pool2(x_h)
                res = None
                if x_l2l is not None and x_l2l.shape[1:3] == conv_out(x_h2l_in):
                    res = x_l2l
                    x_l2l = None                      # consumed by fused epilogue
                x_h2l = conv2d_nhwc(x_h2l_in, self.w_h2l, p, bias=self.b_h2l,
                                    residual=res, compute_dtype=cd)

        # ---- combine whatever was not already fused (rare fallback paths) ----
        if x_l2h is None and x_h2h is not None:
            out_h = x_h2h
        else:
            if x_h2h is not None and x_h2h.shape != x_l2h.shape:
                x_l2h = interp_nearest(x_l2h, x_h2h.shape[1:3])
            out_h = pallas_add(x_h2h, x_l2h) if x_h2h is not None else x_l2h
        if x_h2l is None and x_l2l is not None:
            out_l = x_l2l
        else:
            if x_l2l is not None and x_l2l.shape != x_h2l.shape:
                x_h2l = interp_nearest(x_h2l, x_l2l.shape[1:3])
            out_l = pallas_add(x_l2l, x_h2l) if x_l2l is not None else x_h2l

        output = (to_nchw(out_h), to_nchw(out_l))
        return output[0] if output[1] is None else output


# ---------------------------------------------------------------------------
# Pure-JAX reference (literal transcription of the PyTorch forward) for checking
# ---------------------------------------------------------------------------
def _ref_conv(x, w, padding, b):
    out = lax.conv_general_dilated(
        x, w, window_strides=(1, 1), padding=[(padding, padding)] * 2,
        dimension_numbers=('NHWC', 'HWIO', 'NHWC'),
        precision=lax.Precision.HIGHEST)
    if b is not None:
        out = out + b.reshape(1, 1, 1, -1)
    return out


def _ref_forward(mod, x_h, x_l):
    t = lambda a: None if a is None else jnp.transpose(a, (0, 2, 3, 1))
    ti = lambda a: None if a is None else jnp.transpose(a, (0, 3, 1, 2))
    x_h, x_l = t(x_h), t(x_l)
    conv = lambda x, w, b: _ref_conv(x, w, mod.padding, b)
    out_h, out_l = mod.out_channels['high'], mod.out_channels['low']
    x_h2h = x_h2l = x_l2l = x_l2h = None
    if x_h is not None:
        x_h = avg_pool2(x_h) if out_h > 0 and mod.stride == 2 else x_h
        x_h2h = conv(x_h, mod.w_h2h, mod.b_h2h) if out_h > 0 else None
        x_h2l = avg_pool2(x_h) if out_l > 0 and x_h is not None else x_h
        x_h2l = conv(x_h2l, mod.w_h2l, mod.b_h2l) if out_l > 0 and x_h is not None else None
    if x_l is not None:
        x_l2l = avg_pool2(x_l) if out_l > 0 and mod.stride == 2 else x_l
        x_l2l = conv(x_l2l, mod.w_l2l, mod.b_l2l) if out_l > 0 else None
        x_l2h = conv(x_l, mod.w_l2h, mod.b_l2h) if out_h > 0 else None
        shape_x_l2h = (x_h2h.shape[1:3] if x_h2h is not None
                       else tuple(2 * i for i in x_l.shape[1:3]))
        x_l2h = (interp_nearest(x_l2h, shape_x_l2h)
                 if out_h > 0 and mod.stride == 1 else x_l2h)
    if x_l2h is None and x_h2h is not None:
        x_h = x_h2h
    else:
        x_l2h = (interp_nearest(x_l2h, x_h2h.shape[1:3])
                 if x_h2h is not None and x_h2h.shape != x_l2h.shape else x_l2h)
        x_h = x_h2h + x_l2h if x_h2h is not None else x_l2h
    if x_h2l is None and x_l2l is not None:
        x_l = x_l2l
    else:
        x_h2l = (interp_nearest(x_h2l, x_l2l.shape[1:3])
                 if x_l2l is not None and x_l2l.shape != x_h2l.shape else x_h2l)
        x_l = x_l2l + x_h2l if x_l2l is not None else x_h2l
    out = (ti(x_h), ti(x_l))
    return out[0] if out[1] is None else out


# ---------------------------------------------------------------------------
if __name__ == "__main__":
    key = jax.random.PRNGKey(0)
    k_xh, k_xl, k_w1, k_w2, k_xh2, k_xl2 = jax.random.split(key, 6)

    # ---- config 1: stride 1, alpha 0.5, no bias (canonical octave conv) ----
    x_h = jax.random.normal(k_xh, (2, 4, 16, 16), jnp.float32)   # NCHW, full res
    x_l = jax.random.normal(k_xl, (2, 4, 8, 8), jnp.float32)     # NCHW, half res
    mod = OctConv2dPallas(in_channels=8, out_channels=8, kernel_size=3,
                          stride=1, padding=1, alpha=0.5, bias=False, key=k_w1)
    out_h, out_l = mod((x_h, x_l))
    jax.block_until_ready((out_h, out_l))
    assert out_h.shape == (2, 4, 16, 16) and out_l.shape == (2, 4, 8, 8)
    ref_h, ref_l = _ref_forward(mod, x_h, x_l)
    assert jnp.allclose(out_h, ref_h, rtol=2e-2, atol=2e-2), "high mismatch (stride 1)"
    assert jnp.allclose(out_l, ref_l, rtol=2e-2, atol=2e-2), "low mismatch (stride 1)"

    # ---- config 2: stride 2, asymmetric alpha, bias enabled ----
    x_h2 = jax.random.normal(k_xh2, (2, 6, 16, 16), jnp.float32)
    x_l2 = jax.random.normal(k_xl2, (2, 2, 8, 8), jnp.float32)
    mod2 = OctConv2dPallas(in_channels=8, out_channels=8, kernel_size=3,
                           stride=2, padding=1, alpha=(0.25, 0.5), bias=True, key=k_w2)
    out_h2, out_l2 = mod2((x_h2, x_l2))
    jax.block_until_ready((out_h2, out_l2))
    ref_h2, ref_l2 = _ref_forward(mod2, x_h2, x_l2)
    assert out_h2.shape == ref_h2.shape and out_l2.shape == ref_l2.shape
    assert jnp.allclose(out_h2, ref_h2, rtol=2e-2, atol=2e-2), "high mismatch (stride 2)"
    assert jnp.allclose(out_l2, ref_l2, rtol=2e-2, atol=2e-2), "low mismatch (stride 2)"

    print("KERNEL_OK")
</pallas_src>

<mosaic_0001>
module attributes {stable_mosaic.version = 11 : i64} {
  func.func @_conv_kernel(%arg0: i32, %arg1: i32, %arg2: memref<1x10x10x4xf32, #tpu.memory_space<vmem>>, %arg3: memref<36x8xf32, #tpu.memory_space<vmem>>, %arg4: memref<1x8x8x8xf32, #tpu.memory_space<vmem>>) attributes {dimension_semantics = [#tpu.dimension_semantics<parallel>, #tpu.dimension_semantics<parallel>], iteration_bounds = array<i64: 2, 1>, scalar_prefetch = 0 : i64, scratch_operands = 0 : i64, tpu.core_type = #tpu.core_type<tc>, window_params = [{transform_indices = @transform_0, window_bounds = array<i64: 1, 10, 10, 4>}, {pipeline_mode = #tpu.pipeline_mode<synchronous>, transform_indices = @transform_1, window_bounds = array<i64: 36, 8>}, {transform_indices = @transform_2, window_bounds = array<i64: 1, 8, 8, 8>}]} {
    %c8_i32 = arith.constant 8 : i32
    %0 = arith.muli %arg1, %c8_i32 : i32
    %c0 = arith.constant 0 : index
    %1 = arith.index_cast %0 : i32 to index
    %c0_0 = arith.constant 0 : index
    %c0_1 = arith.constant 0 : index
    %2 = vector.load %arg2[%c0, %1, %c0_0, %c0_1] : memref<1x10x10x4xf32, #tpu.memory_space<vmem>>, vector<1x10x10x4xf32>
    %3 = vector.shape_cast %2 : vector<1x10x10x4xf32> to vector<10x10x4xf32>
    %4 = vector.extract_strided_slice %3 {offsets = [0, 0, 0], sizes = [8, 8, 4], strides = [1, 1, 1]} : vector<10x10x4xf32> to vector<8x8x4xf32>
    %5 = vector.extract_strided_slice %3 {offsets = [0, 1, 0], sizes = [8, 8, 4], strides = [1, 1, 1]} : vector<10x10x4xf32> to vector<8x8x4xf32>
    %6 = vector.extract_strided_slice %3 {offsets = [0, 2, 0], sizes = [8, 8, 4], strides = [1, 1, 1]} : vector<10x10x4xf32> to vector<8x8x4xf32>
    %7 = vector.extract_strided_slice %3 {offsets = [1, 0, 0], sizes = [8, 8, 4], strides = [1, 1, 1]} : vector<10x10x4xf32> to vector<8x8x4xf32>
    %8 = vector.extract_strided_slice %3 {offsets = [1, 1, 0], sizes = [8, 8, 4], strides = [1, 1, 1]} : vector<10x10x4xf32> to vector<8x8x4xf32>
    %9 = vector.extract_strided_slice %3 {offsets = [1, 2, 0], sizes = [8, 8, 4], strides = [1, 1, 1]} : vector<10x10x4xf32> to vector<8x8x4xf32>
    %10 = vector.extract_strided_slice %3 {offsets = [2, 0, 0], sizes = [8, 8, 4], strides = [1, 1, 1]} : vector<10x10x4xf32> to vector<8x8x4xf32>
    %11 = vector.extract_strided_slice %3 {offsets = [2, 1, 0], sizes = [8, 8, 4], strides = [1, 1, 1]} : vector<10x10x4xf32> to vector<8x8x4xf32>
    %12 = vector.extract_strided_slice %3 {offsets = [2, 2, 0], sizes = [8, 8, 4], strides = [1, 1, 1]} : vector<10x10x4xf32> to vector<8x8x4xf32>
    %13 = tpu.concatenate %4, %5, %6, %7, %8, %9, %10, %11, %12 in 2 : vector<8x8x4xf32>, vector<8x8x4xf32>, vector<8x8x4xf32>, vector<8x8x4xf32>, vector<8x8x4xf32>, vector<8x8x4xf32>, vector<8x8x4xf32>, vector<8x8x4xf32>, vector<8x8x4xf32> -> vector<8x8x36xf32>
    %14 = vector.shape_cast %13 : vector<8x8x36xf32> to vector<64x36xf32>
    %c0_2 = arith.constant 0 : index
    %c0_3 = arith.constant 0 : index
    %15 = vector.load %arg3[%c0_2, %c0_3] : memref<36x8xf32, #tpu.memory_space<vmem>>, vector<36x8xf32>
    %cst = arith.constant dense<0.000000e+00> : vector<64x8xf32>
    %16 = tpu.matmul %14, %15, %cst {dimension_numbers = #tpu.dot_dimension_numbers<[1], [0], [0], [1], [0, 0, 1, 1], [], []>} : vector<64x36xf32>, vector<36x8xf32>, vector<64x8xf32> -> vector<64x8xf32>
    %17 = vector.shape_cast %16 : vector<64x8xf32> to vector<8x8x8xf32>
    %c0_4 = arith.constant 0 : index
    %c0_5 = arith.constant 0 : index
    %c0_6 = arith.constant 0 : index
    %c0_7 = arith.constant 0 : index
    %18 = vector.load %arg4[%c0_4, %c0_5, %c0_6, %c0_7] : memref<1x8x8x8xf32, #tpu.memory_space<vmem>>, vector<1x8x8x8xf32>
    %19 = vector.shape_cast %18 : vector<1x8x8x8xf32> to vector<8x8x8xf32>
    %20 = vector.shape_cast %17 : vector<8x8x8xf32> to vector<1x8x8x8xf32>
    tpu.vector_store %arg4[%c0_4, %c0_5, %c0_6, %c0_7], %20 {strides = array<i32>} : memref<1x8x8x8xf32, #tpu.memory_space<vmem>>, vector<1x8x8x8xf32>,
    return
  }
  func.func @transform_0(%arg0: i32, %arg1: i32) -> (i32, i32, i32, i32) {
    %c0_i32 = arith.constant 0 : i32
    %c0_i32_0 = arith.constant 0 : i32
    %c0_i32_1 = arith.constant 0 : i32
    %c0_i32_2 = arith.constant 0 : i32
    return %arg0, %c0_i32, %c0_i32_0, %c0_i32_1 : i32, i32, i32, i32
  }
  func.func @transform_1(%arg0: i32, %arg1: i32) -> (i32, i32) {
    %c0_i32 = arith.constant 0 : i32
    %c0_i32_0 = arith.constant 0 : i32
    %c0_i32_1 = arith.constant 0 : i32
    return %c0_i32, %c0_i32_0 : i32, i32
  }
  func.func @transform_2(%arg0: i32, %arg1: i32) -> (i32, i32, i32, i32) {
    %c0_i32 = arith.constant 0 : i32
    %c0_i32_0 = arith.constant 0 : i32
    %c0_i32_1 = arith.constant 0 : i32
    return %arg0, %arg1, %c0_i32, %c0_i32_0 : i32, i32, i32, i32
  }
}

</mosaic_0001>

<bundles_post_ra>
// kernel: tpu_custom_call.1
= control target key start
LH: loop header
LB: loop body
LE: loop exit
PB: predicated region body
PF: predicated region fallthrough
CT: control target
= control target key end

     0   :  { %7 = vsyncpa [#allocation3], 0  ;;  %s1450_s0 = inlined_call_operand.vmem [shape: f32[2,10,10,4], index: 0, kind: input, shape index: {}]   ;;  %s1451_s1 = inlined_call_operand.vmem [shape: f32[36,8], index: 1, kind: input, shape index: {}]   ;;  %s1452_s2 = inlined_call_operand.hbm [shape: f32[2,8,8,8], index: 2, kind: output, shape index: {}]  }
   0x1   :  { %9 = vsyncpa [#allocation3 + $0x1], 0  ;;  %s1005_s9 = smov 0   ;;  %s1007_s10 = smov 0  }
   0x2   :  { %s1009_s11 = smov 0   ;;  %s1011_s12 = smov 0  }
   0x3   :  { %s1013_s13 = smov 0   ;;  %s1015_s14 = smov 0  }
   0x4 LB: > { %s764_s15 = sadd.s32 4294967295, %s978_s14   ;;  %s765_s16 = sadd.s32 4294967294, %s978_s14   ;;  %s978_s14 = sphi %s1015_s14, %s15_s14   ;;  %s974_s13 = sphi %s1013_s13, %s1459_s13   ;;  %s970_s12 = sphi %s1011_s12, %s1458_s12   ;;  %s966_s11 = sphi %s1009_s11, %s1457_s11   ;;  %s962_s10 = sphi %s1007_s10, %s1456_s10   ;;  %s958_s9 = sphi %s1005_s9, %s1455_s9  }
   0x5   : > { %s27_s17 = sadd.s32 1, %s974_s13  ;;  %s83_s18 = sadd.s32 1, %s966_s11 }
   0x6   : > { %p29_p0 = scmp.ge.s32.totalorder %s27_s17, 2  ;;  %p93_p1 = scmp.ne.s32.totalorder %s966_s11, %s962_s10 }
   0x7   : > { %p94_p2 = scmp.eq.s32.totalorder %s764_s15, 1  ;;  %p99_p3 = scmp.ne.s32.totalorder %s962_s10, %s958_s9 }
   0x8   : > { %s1461_s17 = smov (%p29_p0, %s27_s17), 0  ;;  %p100_p5 = scmp.eq.s32.totalorder %s765_s16, 1 }
   0x9   : > { %p1045_p4 = por %p94_p2, %p93_p1  ;;  %s78_s20 = ssub.s32 %s974_s13, %s1461_s17 }
   0xa   : > { %p768_p6 = scmp.ge.s32.totalorder %s978_s14, 1  ;;  %p81_p7 = scmp.eq.s32.totalorder %s78_s20, 0 }
   0xb   : > { %p1052_p8 = por %p100_p5, %p99_p3  ;;  %p129_p9 = scmp.lt.s32.totalorder %s978_s14, 3 }
   0xc   : > { %s1058_s22 = scalar_select %p81_p7, %s966_s11, %s83_s18  }
   0xd   : > { %p130_p10 = pnand %p768_p6, %p129_p9 }
   0xe   : > { %p151_p11 = scmp.lt.s32.totalorder (!%p130_p10), %s970_s12, 1  ;;  %vm196_vm0 = vcmask (!%p130_p10), 1046528   ;;  %s980_s28 = smov (!%p130_p10), 4   ;;  %vm245_vm1 = vcmask (!%p130_p10), 1045504   ;;  %vm556_vm2 = vcmask (!%p130_p10), 1043456   ;;  %vm454_vm3 = vcmask (!%p130_p10), 31744  }
   0xf   : > { %133 = sbr.rel (%p130_p10) target bundleno = 500 (0x1f4), region = 28  ;;  %s981_s29 = smov (!%p130_p10), 8   ;;  %vm463_vm4 = vcmask (!%p130_p10), 64512   ;;  %vm472_vm5 = vcmask (!%p130_p10), 97280   ;;  %vm481_vm6 = vcmask (!%p130_p10), 130048   ;;  %vm490_vm7 = vcmask (!%p130_p10), 162816  }
  0x10   : > { %s982_s30 = smov (!%p130_p10), 12   ;;  %s983_s3 = smov (!%p130_p10), 16   ;;  %vm499_vm8 = vcmask (!%p130_p10), 195584   ;;  %vm508_vm9 = vcmask (!%p130_p10), 228352   ;;  %vm517_vm10 = vcmask (!%p130_p10), 261120   ;;  %vm531_vm11 = vcmask (!%p130_p10), 293888  }
  0x11   : > { %s984_s4 = smov (!%p130_p10), 20   ;;  %s985_s5 = smov (!%p130_p10), 24  }
  0x12   : > { %s986_s6 = smov (!%p130_p10), 28   ;;  %s988_s16 = smov (!%p130_p10), [#allocation2]  }
  0x13   : > { %s904_s18 = sshll.u32 (!%p130_p10), %s988_s16, 4  ;;  %s905_s18 = int_to_ptr.vmem [resolvable:$false] %s904_s18 }
  0x14   : > { %s906_s20 = scalar_lea.vmem (!%p130_p10), %s905_s18, 2048 }
  0x16   : > { %s152_s23 = scalar_select %p151_p11, %s970_s12, 1 }
  0x18   : > { %s835_s24 = smul.u32 160, %s152_s23 }
  0x1a   : > { %s1065_s27 = scalar_lea.vmem %s1450_s0, %s835_s24 }
  0x1b   : > { %v1068_v0 = vld [vmem:[%s1065_s27 + $0x10] sm:$0xff]  ;;  %v163_v1 = vld [vmem:[%s1065_s27 + $0x18] sm:$0x3]  ;;  %v1072_v2 = vld [vmem:[%s1065_s27] sm:$0xff] }
  0x1c   : > { %v200_v3 = vrot.slane %v1068_v0, 1  ;;  %v201_v4 = vrot.slane %v163_v1, 1  ;;  %v161_v5 = vld [vmem:[%s1065_s27 + $0x8] sm:$0x3]  ;;  %v197_v6 = vrot.slane %v1072_v2, 1  ;;  %v1078_v7 = vld [vmem:[%s1065_s27 + $0x50] sm:$0xff] }
  0x1d   : > { %v198_v8 = vrot.slane %v161_v5, 1  ;;  %v171_v9 = vld [vmem:[%s1065_s27 + $0x58] sm:$0x3]  ;;  %v212_v10 = vrot.slane %v1078_v7, 1  ;;  %v1083_v11 = vld [vmem:[%s1065_s27 + $0x40] sm:$0xff]  ;;  %v246_v22 = vrot.slane %v1072_v2, 2 }
  0x1e   : > { %v202_v12 = vsel %vm196_vm0, %v200_v3, %v201_v4  ;;  %v213_v13 = vrot.slane %v171_v9, 1  ;;  %v169_v14 = vld [vmem:[%s1065_s27 + $0x48] sm:$0x3]  ;;  %v209_v15 = vrot.slane %v1083_v11, 1  ;;  %v258_v19 = vrot.slane %v1083_v11, 2  ;;  %v1111_v31 = vld [vmem:[%s1065_s27 + $0x80] sm:$0xff] }
  0x1f   : > { %223 = vrot.lane.b32.xlu1 %v202_v12, %s980_s28  ;;  %v199_v16 = vsel %vm196_vm0, %v197_v6, %v198_v8  ;;  %v210_v17 = vrot.slane %v169_v14, 1  ;;  %v259_v20 = vrot.slane %v169_v14, 2  ;;  %v247_v23 = vrot.slane %v161_v5, 2  ;;  %v177_v30 = vld [vmem:[%s1065_s27 + $0x88] sm:$0x3]  ;;  %v1123_v37 = vld [vmem:[%s1065_s27 + $0x90] sm:$0xff] }
  0x20   : > { %221 = vrot.lane.b32.xlu0 %v199_v16, %s980_s28  ;;  %v1092_v18 = vsel %vm196_vm0, %v212_v10, %v213_v13  ;;  %v261_v25 = vrot.slane %v1078_v7, 2  ;;  %v262_v26 = vrot.slane %v171_v9, 2  ;;  %v249_v28 = vrot.slane %v1068_v0, 2  ;;  %v179_v33 = vld [vmem:[%s1065_s27 + $0x98] sm:$0x3]  ;;  %v1148_v48 = vld [vmem:[%s1065_s27 + $0x60] sm:$0xff] }
  0x21   : > { %v1096_v21 = vsel %vm196_vm0, %v209_v15, %v210_v17  ;;  %v1104_v24 = vsel %vm245_vm1, %v258_v19, %v259_v20  ;;  %v248_v27 = vsel %vm245_vm1, %v246_v22, %v247_v23  ;;  %v250_v29 = vrot.slane %v163_v1, 2  ;;  %v1151_v49 = vld [vmem:[%s1065_s27 + $0x20] sm:$0xff]  ;;  %v173_v50 = vld [vmem:[%s1065_s27 + $0x68] sm:$0x3]  ;;  %v1169_v58 = vld [vmem:[%s1065_s27 + $0x70] sm:$0xff] }
  0x22   : > { %v320_v32 = vrot.slane %v1111_v31, 1  ;;  %v1119_v34 = vsel %vm245_vm1, %v261_v25, %v262_v26  ;;  %v321_v35 = vrot.slane %v177_v30, 1  ;;  %v347_v36 = vrot.slane %v1111_v31, 2  ;;  %v165_v51 = vld [vmem:[%s1065_s27 + $0x28] sm:$0x3]  ;;  %v1173_v60 = vld [vmem:[%s1065_s27 + $0x30] sm:$0xff] }
  0x23   : > { %231 = vrot.lane.b32.xlu1 %v1092_v18, %s980_s28  ;;  %v251_v38 = vsel %vm245_vm1, %v249_v28, %v250_v29  ;;  %v348_v39 = vrot.slane %v177_v30, 2  ;;  %v400_v40 = vrot.slane %v1123_v37, 1  ;;  %v427_v41 = vrot.slane %v1123_v37, 2  ;;  %v175_v59 = vld [vmem:[%s1065_s27 + $0x78] sm:$0x3]  ;;  %v526_v22 = vld [vmem:[%s1451_s1] sm:$0xff] }
  0x24   : > { %229 = vrot.lane.b32.xlu0 %v1096_v21, %s980_s28  ;;  %v1129_v42 = vsel %vm196_vm0, %v320_v32, %v321_v35  ;;  %v401_v43 = vrot.slane %v179_v33, 1  ;;  %v428_v44 = vrot.slane %v179_v33, 2  ;;  %v215_v52 = vrot.slane %v1148_v48, 1  ;;  %v167_v61 = vld [vmem:[%s1065_s27 + $0x38] sm:$0x3]  ;;  %v527_v23 = vld [vmem:[%s1451_s1 + $0x8] sm:$0xff] }
  0x25   : > { %v1134_v45 = vsel %vm245_vm1, %v347_v36, %v348_v39  ;;  %v216_v53 = vrot.slane %v173_v50, 1  ;;  %v203_v54 = vrot.slane %v1151_v49, 1  ;;  %v204_v55 = vrot.slane %v165_v51, 1  ;;  %v528_v26 = vld [vmem:[%s1451_s1 + $0x10] sm:$0xff]  ;;  %v530_v29 = vld [vmem:[%s1451_s1 + $0x20] sm:$0xf] }
  0x26   : > { %v1138_v46 = vsel %vm196_vm0, %v400_v40, %v401_v43  ;;  %v1141_v47 = vsel %vm245_vm1, %v427_v41, %v428_v44  ;;  %v218_v62 = vrot.slane %v1169_v58, 1  ;;  %v219_v63 = vrot.slane %v175_v59, 1  ;;  %s987_s27 = smov 32  }
  0x27   : > { %278 = vrot.lane.b32.xlu1 %v1104_v24, %s981_s29  ;;  %v217_v56 = vsel %vm196_vm0, %v215_v52, %v216_v53  ;;  %v205_v57 = vsel %vm196_vm0, %v203_v54, %v204_v55  ;;  %v206_v1 = vrot.slane %v1173_v60, 1  ;;  %v207_v3 = vrot.slane %v167_v61, 1 }
  0x28   : > { %270 = vrot.lane.b32.xlu0 %v248_v27, %s981_s29  ;;  %v220_v4 = vsel %vm196_vm0, %v218_v62, %v219_v63  ;;  %v264_v5 = vrot.slane %v1148_v48, 2  ;;  %v265_v6 = vrot.slane %v173_v50, 2  ;;  %v252_v9 = vrot.slane %v1151_v49, 2  ;;  %v529_v27 = vld [vmem:[%s1451_s1 + $0x18] sm:$0xff] }
  0x29   : > { %v208_v8 = vsel %vm196_vm0, %v206_v1, %v207_v3  ;;  %v253_v10 = vrot.slane %v165_v51, 2  ;;  %v267_v14 = vrot.slane %v1169_v58, 2  ;;  %v268_v15 = vrot.slane %v175_v59, 2 }
  0x2a   : > { %v255_v16 = vrot.slane %v1173_v60, 2  ;;  %v256_v17 = vrot.slane %v167_v61, 2  ;;  %v821_v25 = vpack.c.bf16 %v527_v23, %v526_v22  ;;  %v825_v28 = vpack.c.bf16 %v529_v27, %v528_v26 }
  0x2b   : > { %280 = vrot.lane.b32.xlu1 %v1119_v34, %s981_s29  ;;  %v254_v13 = vsel %vm245_vm1, %v252_v9, %v253_v10  ;;  %v269_v19 = vsel %vm245_vm1, %v267_v14, %v268_v15 }
  0x2c   : > { %272 = vrot.lane.b32.xlu0 %v251_v38, %s981_s29  ;;  %v257_v20 = vsel %vm245_vm1, %v255_v16, %v256_v17  ;;  %822 = vmatprep.subr.bf16.mxu0 %v821_v25 }
  0x2d   : > { %829 = vmatprep.subr.bf16.mxu1 %v821_v25  ;;  %824 = vmatpush3.bf16.msra.mxu0 %v821_v25 }
  0x2e   : > { %832 = vmatpush3.bf16.msra.mxu1 %v821_v25  ;;  %826 = vmatprep.subr.bf16.mxu0 %v825_v28 }
  0x2f   : > { %303 = vrot.lane.b32.xlu1 %v1078_v7, %s982_s30  ;;  %830 = vmatprep.subr.bf16.mxu1 %v825_v28 }
  0x30   : > { %295 = vrot.lane.b32.xlu0 %v1068_v0, %s982_s30 }
  0x31   : > { %828 = vmatpush3.bf16.msra.mxu0 %v825_v28 }
  0x32   : > { %833 = vmatpush3.bf16.msra.mxu1 %v825_v28  ;;  %807 = vmatprep.subr.msk.mxu0 %vm556_vm2, %v530_v29 }
  0x33   : > { %305 = vrot.lane.b32.xlu1 %v1148_v48, %s982_s30  ;;  %831 = vmatprep.subr.msk.mxu1 %vm556_vm2, %v530_v29 }
  0x34   : > { %297 = vrot.lane.b32.xlu0 %v1151_v49, %s982_s30 }
  0x35   : > { %808 = vmatpush3.msk.msra.mxu0 %vm556_vm2, %v530_v29 }
  0x36   : > { %834 = vmatpush3.msk.msra.mxu1 %vm556_vm2, %v530_v29 }
  0x37   : > { %331 = vrot.lane.b32.xlu1 %v1092_v18, %s983_s3 }
  0x38   : > { %323 = vrot.lane.b32.xlu0 %v202_v12, %s983_s3  ;;  %v266_v12 = vsel %vm245_vm1, %v264_v5, %v265_v6 }
  0x3b   : > { %233 = vrot.lane.b32.xlu1 %v217_v56, %s980_s28 }
  0x3c   : > { %225 = vrot.lane.b32.xlu0 %v205_v57, %s980_s28 }
  0x3f   : > { %333 = vrot.lane.b32.xlu1 %v217_v56, %s983_s3 }
  0x40   : > { %325 = vrot.lane.b32.xlu0 %v205_v57, %s983_s3 }
  0x43   : > { %358 = vrot.lane.b32.xlu1 %v1119_v34, %s984_s4 }
  0x44   : > { %350 = vrot.lane.b32.xlu0 %v251_v38, %s984_s4 }
  0x47   : > { %235 = vrot.lane.b32.xlu1 %v220_v4, %s980_s28 }
  0x48   : > { %227 = vrot.lane.b32.xlu0 %v208_v8, %s980_s28  ;;  %s148_s28 = sand.u32 1, %s962_s10  }
  0x4b   : > { %282 = vrot.lane.b32.xlu1 %v266_v12, %s981_s29 }
  0x4c   : > { %274 = vrot.lane.b32.xlu0 %v254_v13, %s981_s29 }
  0x4f   : > { %360 = vrot.lane.b32.xlu1 %v266_v12, %s984_s4 }
  0x50   : > { %352 = vrot.lane.b32.xlu0 %v254_v13, %s984_s4 }
  0x53   : > { %383 = vrot.lane.b32.xlu1 %v1148_v48, %s985_s5 }
  0x54   : > { %375 = vrot.lane.b32.xlu0 %v1151_v49, %s985_s5 }
  0x57   : > { %284 = vrot.lane.b32.xlu1 %v269_v19, %s981_s29 }
  0x58   : > { %276 = vrot.lane.b32.xlu0 %v257_v20, %s981_s29 }
  0x5b   : > { %307 = vrot.lane.b32.xlu1 %v1169_v58, %s982_s30 }
  0x5c   : > { %299 = vrot.lane.b32.xlu0 %v1173_v60, %s982_s30 }
  0x5f   : > { %385 = vrot.lane.b32.xlu1 %v1169_v58, %s985_s5 }
  0x60   : > { %377 = vrot.lane.b32.xlu0 %v1173_v60, %s985_s5 }
  0x63   : > { %411 = vrot.lane.b32.xlu1 %v217_v56, %s986_s6 }
  0x64   : > { %403 = vrot.lane.b32.xlu0 %v205_v57, %s986_s6 }
  0x67   : > { %309 = vrot.lane.b32.xlu1 %v1111_v31, %s982_s30 }
  0x68   : > { %301 = vrot.lane.b32.xlu0 %v1083_v11, %s982_s30  ;;  %s769_s30 = sshll.u32 %s148_s28, 6 }
  0x6b   : > { %335 = vrot.lane.b32.xlu1 %v220_v4, %s983_s3 }
  0x6c   : > { %327 = vrot.lane.b32.xlu0 %v208_v8, %s983_s3 }
  0x6f   : > { %413 = vrot.lane.b32.xlu1 %v220_v4, %s986_s6 }
  0x70   : > { %405 = vrot.lane.b32.xlu0 %v208_v8, %s986_s6 }
  0x73   : > { %438 = vrot.lane.b32.xlu1 %v266_v12, %s987_s27 }
  0x74   : > { %430 = vrot.lane.b32.xlu0 %v254_v13, %s987_s27 }
  0x77   : > { %337 = vrot.lane.b32.xlu1 %v1129_v42, %s983_s3 }
  0x78   : > { %329 = vrot.lane.b32.xlu0 %v1096_v21, %s983_s3  ;;  %s150_s3 = scalar_lea.vmem [#allocation2], %s769_s30 }
  0x7b   : > { %362 = vrot.lane.b32.xlu1 %v269_v19, %s984_s4 }
  0x7c   : > { %354 = vrot.lane.b32.xlu0 %v257_v20, %s984_s4 }
  0x7f   : > { %440 = vrot.lane.b32.xlu1 %v269_v19, %s987_s27 }
  0x80   : > { %432 = vrot.lane.b32.xlu0 %v257_v20, %s987_s27 }
  0x83   : > { %364 = vrot.lane.b32.xlu1 %v1134_v45, %s984_s4 }
  0x84   : > { %356 = vrot.lane.b32.xlu0 %v1104_v24, %s984_s4  ;;  %s785_s4 = sshll.u32 %s970_s12, 10  ;;  %s1403_s12 = scalar_lea.sflag [#allocation3], %s148_s28 }
  0x85   : > { %s1395_s8 = scalar_lea.hbm %s1452_s2, %s785_s4 }
  0x87   : > { %387 = vrot.lane.b32.xlu1 %v1111_v31, %s985_s5 }
  0x88   : > { %379 = vrot.lane.b32.xlu0 %v1083_v11, %s985_s5 }
  0x8b   : > { %389 = vrot.lane.b32.xlu1 %v1123_v37, %s985_s5 }
  0x8c   : > { %381 = vrot.lane.b32.xlu0 %v1078_v7, %s985_s5  ;;  %s689_s5 = sshll.u32 %s150_s3, 4  ;;  %s1398_s5 = int_to_ptr.vmem [resolvable:$true] %s689_s5 }
  0x8d   : > { %s900_s15 = scalar_lea.vmem %s1398_s5, 1024  ;;  %p907_p1 = scmp.lt.s32.totalorder %s1398_s5, %s905_s18 }
  0x8e   : > { %p901_p12 = scmp.ne.s32.totalorder %s1398_s5, %s900_s15  ;;  %p908_p2 = scmp.lt.s32.totalorder %s906_s20, %s900_s15 }
  0x8f   : > { %415 = vrot.lane.b32.xlu1 %v1129_v42, %s986_s6 }
  0x90   : > { %407 = vrot.lane.b32.xlu0 %v1096_v21, %s986_s6  ;;  %p902_p13 = pnand %p901_p12, %p1045_p4  ;;  %p909_p3 = por %p908_p2, %p907_p1 }
  0x91   : > { %v224_v30 = vpop.permute.xlu1 %223 }
  0x92   : > { %v222_v32 = vpop.permute.xlu0 %221  ;;  %p903_p0 = pneg %p902_p13 }
  0x93   : > { %417 = vrot.lane.b32.xlu1 %v1138_v46, %s986_s6  ;;  %v455_v36 = vsel %vm454_vm3, %v1072_v2, %v222_v32 }
  0x94   : > { %409 = vrot.lane.b32.xlu0 %v1092_v18, %s986_s6  ;;  %p910_p5 = pnand %p909_p3, %p903_p0 }
  0x95   : > { %v232_v31 = vpop.permute.xlu1 %231 }
  0x96   : > { %v230_v33 = vpop.permute.xlu0 %229 }
  0x97   : > { %442 = vrot.lane.b32.xlu1 %v1134_v45, %s987_s27  ;;  %v459_v21 = vsel %vm454_vm3, %v1083_v11, %v230_v33  ;;  %v456_v11 = vsel %vm454_vm3, %v1068_v0, %v224_v30 }
  0x98   : > { %434 = vrot.lane.b32.xlu0 %v1104_v24, %s987_s27  ;;  %v460_v24 = vsel %vm454_vm3, %v1078_v7, %v232_v31 }
  0x99   : > { %v279_v35 = vpop.permute.xlu1 %278 }
  0x9a   : > { %v468_v37 = vsel %vm463_vm4, %v459_v21, %v279_v35  ;;  %v271_v18 = vpop.permute.xlu0 %270 }
  0x9b   : > { %v464_v38 = vsel %vm463_vm4, %v455_v36, %v271_v18  ;;  %444 = vrot.lane.b32.xlu1 %v1141_v47, %s987_s27 }
  0x9c   : > { %436 = vrot.lane.b32.xlu0 %v1119_v34, %s987_s27 }
  0x9d   : > { %v281_v39 = vpop.permute.xlu1 %280 }
  0x9e   : > { %v469_v2 = vsel %vm463_vm4, %v460_v24, %v281_v39  ;;  %v273_v40 = vpop.permute.xlu0 %272 }
  0x9f   : > { %v465_v41 = vsel %vm463_vm4, %v456_v11, %v273_v40 }
  0xa1   : > { %v304_v42 = vpop.permute.xlu1 %303 }
  0xa2   : > { %v296_v43 = vpop.permute.xlu0 %295  ;;  %v477_v20 = vsel %vm472_vm5, %v468_v37, %v304_v42 }
  0xa3   : > { %v473_v23 = vsel %vm472_vm5, %v464_v38, %v296_v43 }
  0xa5   : > { %v306_v44 = vpop.permute.xlu1 %305 }
  0xa6   : > { %v1289_v45 = vsel %vm472_vm5, %v469_v2, %v306_v44  ;;  %v298_v34 = vpop.permute.xlu0 %297 }
  0xa7   : > { %v1292_v46 = vsel %vm472_vm5, %v465_v41, %v298_v34 }
  0xa9   : > { %v332_v7 = vpop.permute.xlu1 %331 }
  0xaa   : > { %v324_v47 = vpop.permute.xlu0 %323  ;;  %v486_v25 = vsel %vm481_vm6, %v477_v20, %v332_v7 }
  0xab   : > { %v482_v27 = vsel %vm481_vm6, %v473_v23, %v324_v47 }
  0xad   : > { %v234_v50 = vpop.permute.xlu1 %233 }
  0xae   : > { %v226_v0 = vpop.permute.xlu0 %225  ;;  %v461_v57 = vsel %vm454_vm3, %v1148_v48, %v234_v50 }
  0xaf   : > { %v457_v61 = vsel %vm454_vm3, %v1151_v49, %v226_v0 }
  0xb1   : > { %v334_v51 = vpop.permute.xlu1 %333 }
  0xb2   : > { %v326_v52 = vpop.permute.xlu0 %325  ;;  %v487_v39 = vsel %vm481_vm6, %v1289_v45, %v334_v51 }
  0xb3   : > { %v483_v2 = vsel %vm481_vm6, %v1292_v46, %v326_v52 }
  0xb5   : > { %v359_v53 = vpop.permute.xlu1 %358 }
  0xb6   : > { %v351_v54 = vpop.permute.xlu0 %350  ;;  %v495_v28 = vsel %vm490_vm7, %v486_v25, %v359_v53 }
  0xb7   : > { %v491_v29 = vsel %vm490_vm7, %v482_v27, %v351_v54 }
  0xb9   : > { %v1294_v55 = vpop.permute.xlu1 %235 }
  0xba   : > { %v1296_v56 = vpop.permute.xlu0 %227 }
  0xbd   : > { %v283_v59 = vpop.permute.xlu1 %282 }
  0xbe   : > { %v1303_v62 = vsel %vm463_vm4, %v461_v57, %v283_v59  ;;  %v275_v63 = vpop.permute.xlu0 %274 }
  0xbf   : > { %v1306_v1 = vsel %vm463_vm4, %v457_v61, %v275_v63 }
  0xc1   : > { %v361_v3 = vpop.permute.xlu1 %360 }
  0xc2   : > { %v353_v4 = vpop.permute.xlu0 %352  ;;  %v496_v40 = vsel %vm490_vm7, %v487_v39, %v361_v3 }
  0xc3   : > { %v492_v41 = vsel %vm490_vm7, %v483_v2, %v353_v4 }
  0xc5   : > { %v384_v5 = vpop.permute.xlu1 %383 }
  0xc6   : > { %v376_v6 = vpop.permute.xlu0 %375  ;;  %v504_v30 = vsel %vm499_vm8, %v495_v28, %v384_v5 }
  0xc7   : > { %v500_v32 = vsel %vm499_vm8, %v491_v29, %v376_v6  ;;  %v462_v6 = vsel %vm454_vm3, %v1169_v58, %v1294_v55 }
  0xc9   : > { %v1308_v8 = vpop.permute.xlu1 %284 }
  0xca   : > { %v1310_v9 = vpop.permute.xlu0 %276 }
  0xcd   : > { %v308_v48 = vpop.permute.xlu1 %307 }
  0xce   : > { %v300_v10 = vpop.permute.xlu0 %299  ;;  %v479_v61 = vsel %vm472_vm5, %v1303_v62, %v308_v48  ;;  %v471_v62 = vsel %vm463_vm4, %v462_v6, %v1308_v8 }
  0xcf   : > { %v475_v3 = vsel %vm472_vm5, %v1306_v1, %v300_v10 }
  0xd1   : > { %v386_v12 = vpop.permute.xlu1 %385 }
  0xd2   : > { %v378_v13 = vpop.permute.xlu0 %377  ;;  %v505_v42 = vsel %vm499_vm8, %v496_v40, %v386_v12 }
  0xd3   : > { %v501_v43 = vsel %vm499_vm8, %v492_v41, %v378_v13 }
  0xd5   : > { %v412_v49 = vpop.permute.xlu1 %411 }
  0xd6   : > { %v404_v14 = vpop.permute.xlu0 %403  ;;  %v513_v31 = vsel %vm508_vm9, %v504_v30, %v412_v49  ;;  %v458_v49 = vsel %vm454_vm3, %v1173_v60, %v1296_v56 }
  0xd7   : > { %v509_v21 = vsel %vm508_vm9, %v500_v32, %v404_v14  ;;  %v467_v10 = vsel %vm463_vm4, %v458_v49, %v1310_v9 }
  0xd9   : > { %v1312_v15 = vpop.permute.xlu1 %309 }
  0xda   : > { %v1314_v16 = vpop.permute.xlu0 %301  ;;  %v480_v58 = vsel %vm472_vm5, %v471_v62, %v1312_v15 }
  0xdb   : > { %v476_v60 = vsel %vm472_vm5, %v467_v10, %v1314_v16 }
  0xdd   : > { %v336_v17 = vpop.permute.xlu1 %335 }
  0xde   : > { %v328_v19 = vpop.permute.xlu0 %327  ;;  %v488_v4 = vsel %vm481_vm6, %v479_v61, %v336_v17 }
  0xdf   : > { %v484_v12 = vsel %vm481_vm6, %v475_v3, %v328_v19 }
  0xe1   : > { %v414_v22 = vpop.permute.xlu1 %413 }
  0xe2   : > { %v406_v26 = vpop.permute.xlu0 %405  ;;  %v514_v44 = vsel %vm508_vm9, %v505_v42, %v414_v22 }
  0xe3   : > { %v510_v7 = vsel %vm508_vm9, %v501_v43, %v406_v26 }
  0xe5   : > { %v439_v33 = vpop.permute.xlu1 %438 }
  0xe6   : > { %v431_v35 = vpop.permute.xlu0 %430  ;;  %v522_v36 = vsel %vm517_vm10, %v513_v31, %v439_v33 }
  0xe7   : > { %v518_v37 = vsel %vm517_vm10, %v509_v21, %v431_v35  ;;  %815 = vmatprep.mubr.msk.f32.mxu1 %vm531_vm11, %v522_v36 }
  0xe8   : > { %809 = vmatprep.mubr.msk.f32.mxu0 %vm531_vm11, %v518_v37 }
  0xe9   : > { %v338_v18 = vpop.permute.xlu1 %337 }
  0xea   : > { %v330_v38 = vpop.permute.xlu0 %329  ;;  %v489_v56 = vsel %vm481_vm6, %v480_v58, %v338_v18 }
  0xeb   : > { %v485_v9 = vsel %vm481_vm6, %v476_v60, %v330_v38 }
  0xed   : > { %v363_v24 = vpop.permute.xlu1 %362 }
  0xee   : > { %v355_v11 = vpop.permute.xlu0 %354  ;;  %v497_v13 = vsel %vm490_vm7, %v488_v4, %v363_v24 }
  0xef   : > { %v493_v1 = vsel %vm490_vm7, %v484_v12, %v355_v11 }
  0xf1   : > { %v441_v34 = vpop.permute.xlu1 %440 }
  0xf2   : > { %v523_v47 = vsel %vm517_vm10, %v514_v44, %v441_v34  ;;  %v433_v45 = vpop.permute.xlu0 %432 }
  0xf3   : > { %v519_v50 = vsel %vm517_vm10, %v510_v7, %v433_v45  ;;  %816 = vmatmul.mubr.msk.f32.vlgmr.msra.gmra.mrb[0].mxu1 %vm531_vm11, %v523_v47 }
  0xf4   : > { %810 = vmatmul.mubr.msk.f32.vlgmr.msra.gmra.mrb[0].mxu0 %vm531_vm11, %v519_v50 }
  0xf5   : > { %v365_v46 = vpop.permute.xlu1 %364 }
  0xf6   : > { %v357_v0 = vpop.permute.xlu0 %356  ;;  %v498_v15 = vsel %vm490_vm7, %v489_v56, %v365_v46 }
  0xf7   : > { %v494_v23 = vsel %vm490_vm7, %v485_v9, %v357_v0 }
  0xf9   : > { %v388_v51 = vpop.permute.xlu1 %387 }
  0xfa   : > { %v380_v52 = vpop.permute.xlu0 %379  ;;  %v506_v48 = vsel %vm499_vm8, %v497_v13, %v388_v51 }
  0xfb   : > { %v502_v55 = vsel %vm499_vm8, %v493_v1, %v380_v52 }
  0xfd   : > { %v390_v53 = vpop.permute.xlu1 %389 }
  0xfe   : > { %v382_v54 = vpop.permute.xlu0 %381  ;;  %v507_v16 = vsel %vm499_vm8, %v498_v15, %v390_v53 }
  0xff   : > { %v503_v25 = vsel %vm499_vm8, %v494_v23, %v382_v54 }
 0x101   : > { %v416_v57 = vpop.permute.xlu1 %415 }
 0x102   : > { %v408_v59 = vpop.permute.xlu0 %407  ;;  %v515_v14 = vsel %vm508_vm9, %v506_v48, %v416_v57 }
 0x103   : > { %v511_v8 = vsel %vm508_vm9, %v502_v55, %v408_v59 }
 0x105   : > { %v418_v63 = vpop.permute.xlu1 %417 }
 0x106   : > { %v410_v5 = vpop.permute.xlu0 %409  ;;  %v516_v26 = vsel %vm508_vm9, %v507_v16, %v418_v63 }
 0x107   : > { %v512_v28 = vsel %vm508_vm9, %v503_v25, %v410_v5 }
 0x109   : > { %v443_v17 = vpop.permute.xlu1 %442 }
 0x10a   : > { %v524_v19 = vsel %vm517_vm10, %v515_v14, %v443_v17  ;;  %v435_v20 = vpop.permute.xlu0 %434 }
 0x10b   : > { %v520_v22 = vsel %vm517_vm10, %v511_v8, %v435_v20  ;;  %818 = vmatprep.mubr.msk.f32.mxu1 %vm531_vm11, %v524_v19 }
 0x10c   : > { %812 = vmatprep.mubr.msk.f32.mxu0 %vm531_vm11, %v520_v22 }
 0x10d   : > { %v445_v27 = vpop.permute.xlu1 %444 }
 0x10e   : > { %v525_v29 = vsel %vm517_vm10, %v516_v26, %v445_v27  ;;  %v437_v30 = vpop.permute.xlu0 %436 }
 0x10f   : > { %v521_v32 = vsel %vm517_vm10, %v512_v28, %v437_v30  ;;  %819 = vmatmul.mubr.msk.f32.gmra.mrb[2].mxu1 %vm531_vm11, %v525_v29 }
 0x110   : > { %813 = vmatmul.mubr.msk.f32.gmra.mrb[2].mxu0 %vm531_vm11, %v521_v32 }
 0x1c6   : > { %v817_v31 = vpop.f32.mrb[0].mxu1 }
 0x1c7   : > { %v811_v33 = vpop.f32.mrb[0].mxu0  ;;  %670 = vst.msk [vmem:[%s150_s3 + $0x28] sm:$0xff] %vm463_vm4, %v817_v31  ;;  %v646_v21 = vpop.f32.mrb[1].mxu1 }
 0x1c8   : > { %666 = vst.msk [vmem:[%s150_s3 + $0x8] sm:$0xff] %vm463_vm4, %v811_v33  ;;  %v626_v35 = vpop.f32.mrb[1].mxu0  ;;  %669 = vst.msk [vmem:[%s150_s3 + $0x20] sm:$0xff] %vm463_vm4, %v646_v21 }
 0x1c9   : > { %665 = vst.msk [vmem:[%s150_s3] sm:$0xff] %vm463_vm4, %v626_v35 }
 0x1e2   : > { %v820_v36 = vpop.f32.mrb[2].mxu1 }
 0x1e3   : > { %v814_v37 = vpop.f32.mrb[2].mxu0  ;;  %672 = vst.msk [vmem:[%s150_s3 + $0x38] sm:$0xff] %vm463_vm4, %v820_v36  ;;  %v656_v18 = vpop.f32.mrb[3].mxu1 }
 0x1e4   : > { %668 = vst.msk [vmem:[%s150_s3 + $0x18] sm:$0xff] %vm463_vm4, %v814_v37  ;;  %v636_v38 = vpop.f32.mrb[3].mxu0  ;;  %671 = vst.msk [vmem:[%s150_s3 + $0x30] sm:$0xff] %vm463_vm4, %v656_v18 }
 0x1e5   : > { %667 = vst.msk [vmem:[%s150_s3 + $0x10] sm:$0xff] %vm463_vm4, %v636_v38 }
 0x1e6   : > { %913 = shalt.err (!%p910_p5)
}
 0x1e7   : > { %s914_s23 = scalar_lea.hbm %s1395_s8, 1024  ;;  %s918_s26 = scalar_lea.hbm %s1452_s2, 2048 }
 0x1e8   : > { %p915_p6 = scmp.ne.s32.totalorder %s1395_s8, %s914_s23  ;;  %p919_p10 = scmp.lt.u32.totalorder %s1395_s8, %s1452_s2 }
 0x1e9   : > { %p920_p11 = scmp.lt.u32.totalorder %s918_s26, %s914_s23  ;;  %p922_p13 = scmp.lt.u32.totalorder %s914_s23, %s1395_s8 }
 0x1ea   : > { %p916_p7 = pnand %p915_p6, %p1045_p4 }
 0x1eb   : > { %p921_p12 = por %p920_p11, %p919_p10 }
 0x1ec   : > { %p917_p9 = pneg %p916_p7 }
 0x1ed   : > { %p923_p0 = por %p922_p13, %p921_p12 }
 0x1ef   : > { %p924_p1 = pnand %p923_p0, %p917_p9 }
 0x1f1   : > { %927 = shalt.err (!%p924_p1)
}
 0x1f2   : > { %s989_s30 = smov 128  }
 0x1f3   : > { %836 = dma.vmem_to_hbm [thread:$0]  (%p1045_p4), %s1398_s5, 1024, %s1395_s8, %s1403_s12, %s989_s30, %s989_s30, %s981_s29  }
 0x1f4 PF: > { %p842_p2 = scmp.ge.s32.totalorder %s978_s14, 2  ;;  %s704_s3 = sand.u32 1, %s958_s9  }
 0x1f5   : > { %s705_s4 = scalar_lea.sflag [#allocation3], %s704_s3 }
 0x1f6   : > { %p839_p3 = pnand %p842_p2, %p1052_p8 }
 0x1f8   : > { %953 = dma.done.wait (!%p839_p3), %s705_s4, 1024  }
 0x1f9   : > { %955 = vsyncadd (!%p839_p3), %s705_s4, 4294966272  ;;  %s15_s14 = sadd.s32 1, %s978_s14   ;;  %s1455_s9 = smov %s962_s10 }
 0x1fa   : > { %p12_p5 = scmp.ge.s32.totalorder %s15_s14, 4   ;;  %s1456_s10 = smov %s966_s11 }
 0x1fb   : > { %s1457_s11 = smov %s1058_s22  ;;  %s1458_s12 = smov %s974_s13 }
 0x1fc   : > { %s1459_s13 = smov %s1461_s17  ;;  %14 = sbr.rel (!%p12_p5) target bundleno = 4 (0x4), region = 64 }
 0x203   :  { %710 = vsyncpa [#allocation3], 1 }
 0x204   :  { %712 = vsyncpa [#allocation3 + $0x1], 1 }

</bundles_post_ra>
